<compile_context>
chip_gen: v7x
topology: tpu7x:2x2x1
jax: 0.10.0
libtpu: 0.0.40
codegen_flags: <defaults>
</compile_context>

<pallas_src>
import jax
import jax.numpy as jnp
from jax import lax
from jax.experimental import pallas as pl
from jax.experimental.pallas import tpu as pltpu


def _mlp_kernel(x_ref, w1_ref, b1_ref, w2_ref, b2_ref, o_ref):
    # x_ref: (block_m, Ep)   w1_ref/w2_ref: (Ep, Ep) PyTorch (out, in) layout
    # b1_ref/b2_ref: (1, Ep) f32
    x = x_ref[...]
    w1 = w1_ref[...]
    w2 = w2_ref[...]

    # fc1: x @ w1^T -- contract x dim 1 against w1's "in" dim 1 directly on the
    # MXU (no transpose materialized), accumulate in f32, bias add in f32.
    h = lax.dot_general(x, w1,
                        dimension_numbers=(((1,), (1,)), ((), ())),
                        preferred_element_type=jnp.float32)
    h = jnp.maximum(h + b1_ref[...], 0.0)

    # Dropout2d -> identity (eval/inference mode).

    # fc2: deliberate cast of the ReLU output to the weight/MXU input dtype
    # (no-op in the f32 path); accumulation stays f32.
    y = lax.dot_general(h.astype(w2.dtype), w2,
                        dimension_numbers=(((1,), (1,)), ((), ())),
                        preferred_element_type=jnp.float32)
    y = y + b2_ref[...]
    o_ref[...] = y.astype(o_ref.dtype)


def _round_up(v, m):
    return (v + m - 1) // m * m


def _pick_block_m(e_pad, act_itemsize, w_itemsize):
    """Largest 128-aligned M tile whose working set fits a v7x-safe VMEM budget."""
    budget = 40 * 1024 * 1024  # leaves headroom inside v7x's 64 MiB physical VMEM
    # 2 resident weight matrices + 2 biases (padded to 8 sublanes, f32).
    weight_bytes = 2 * e_pad * e_pad * w_itemsize + 2 * 8 * e_pad * 4
    for cand in (1024, 512, 256, 128):
        act_bytes = 2 * 2 * cand * e_pad * act_itemsize  # x + out, double-buffered
        tmp_bytes = 2 * cand * e_pad * 4                 # f32 matmul results
        if weight_bytes + act_bytes + tmp_bytes <= budget:
            return cand, weight_bytes
    # TODO(synk): for very large embed (weights alone exceed the VMEM budget),
    # add N/K weight tiling with a VMEM scratch accumulator instead of keeping
    # both full (E, E) weights resident.
    return 128, weight_bytes


def mini_triplet_forward(x, w1, b1, w2, b2, *, mxu_dtype=None):
    """x: (..., embed). w1, w2: (embed, embed) in PyTorch (out, in) layout.
    b1, b2: (embed,). Returns same shape/dtype as x.

    mxu_dtype: optional dtype for the MXU inputs (e.g. jnp.bfloat16 on
    v6e/v7x); matmuls always accumulate in f32 and output keeps x.dtype.
    """
    orig_shape = x.shape
    out_dtype = x.dtype
    embed = orig_shape[-1]
    x2d = x.reshape(-1, embed)  # (M, E) glue reshape
    m = x2d.shape[0]

    in_dtype = mxu_dtype if mxu_dtype is not None else x.dtype
    w_dtype = mxu_dtype if mxu_dtype is not None else w1.dtype

    # Lane-pad E to a multiple of 128 (zero padding keeps the math exact:
    # padded hidden columns are relu(0 + 0) = 0 and contribute nothing to fc2).
    # When embed % 128 == 0 this is a no-op (no wrapper-side weight rewrite).
    e_pad = _round_up(embed, 128)
    pad_e = e_pad - embed

    block_m, weight_bytes = _pick_block_m(
        e_pad, jnp.dtype(in_dtype).itemsize, jnp.dtype(w_dtype).itemsize)
    block_m = min(block_m, _round_up(m, 8))
    m_pad = _round_up(m, block_m)

    if pad_e or m_pad != m:
        x2d = jnp.pad(x2d, ((0, m_pad - m), (0, pad_e)))
    if pad_e:
        w1 = jnp.pad(w1, ((0, pad_e), (0, pad_e)))
        w2 = jnp.pad(w2, ((0, pad_e), (0, pad_e)))
        b1 = jnp.pad(b1, (0, pad_e))
        b2 = jnp.pad(b2, (0, pad_e))

    x2d = x2d.astype(in_dtype)
    w1 = w1.astype(w_dtype)
    w2 = w2.astype(w_dtype)
    b1_2d = b1.reshape(1, e_pad).astype(jnp.float32)
    b2_2d = b2.reshape(1, e_pad).astype(jnp.float32)

    act_itemsize = jnp.dtype(in_dtype).itemsize
    vmem_limit = (weight_bytes
                  + 2 * 2 * block_m * e_pad * act_itemsize
                  + 2 * block_m * e_pad * 4
                  + (4 << 20))
    vmem_limit = int(min(max(vmem_limit, 16 << 20), 48 << 20))

    out2d = pl.pallas_call(
        _mlp_kernel,
        out_shape=jax.ShapeDtypeStruct((m_pad, e_pad), out_dtype),
        grid=(m_pad // block_m,),
        in_specs=[
            pl.BlockSpec((block_m, e_pad), lambda i: (i, 0)),  # x tile (pipelined)
            pl.BlockSpec((e_pad, e_pad), lambda i: (0, 0)),    # w1 (resident)
            pl.BlockSpec((1, e_pad), lambda i: (0, 0)),        # b1 (resident)
            pl.BlockSpec((e_pad, e_pad), lambda i: (0, 0)),    # w2 (resident)
            pl.BlockSpec((1, e_pad), lambda i: (0, 0)),        # b2 (resident)
        ],
        out_specs=pl.BlockSpec((block_m, e_pad), lambda i: (i, 0)),
        compiler_params=pltpu.CompilerParams(
            dimension_semantics=("parallel",),   # lets v7x shard M over 2 TCs
            vmem_limit_bytes=vmem_limit,
        ),
    )(x2d, w1, b1_2d, w2, b2_2d)

    return out2d[:m, :embed].reshape(orig_shape)


def _init_linear(key, embed):
    """Deterministic PyTorch-style Linear init: U(-1/sqrt(in), 1/sqrt(in))."""
    kw, kb = jax.random.split(key)
    bound = 1.0 / jnp.sqrt(jnp.float32(embed))
    w = jax.random.uniform(kw, (embed, embed), jnp.float32, -bound, bound)
    b = jax.random.uniform(kb, (embed,), jnp.float32, -bound, bound)
    return w, b


if __name__ == "__main__":
    key = jax.random.PRNGKey(0)
    k_x, k_fc1, k_fc2 = jax.random.split(key, 3)

    batch, seq, embed = 2, 8, 32
    x = jax.random.normal(k_x, (batch, seq, embed), jnp.float32)

    w1, b1 = _init_linear(k_fc1, embed)
    w2, b2 = _init_linear(k_fc2, embed)

    # Reference in plain JAX (fc1 -> relu -> identity dropout -> fc2).
    ref = jnp.maximum(x @ w1.T + b1, 0.0) @ w2.T + b2

    # f32 path (exact semantics).
    out = mini_triplet_forward(x, w1, b1, w2, b2)
    out = jax.block_until_ready(out)
    assert out.shape == x.shape and out.dtype == x.dtype
    assert jnp.allclose(out, ref, atol=1e-4, rtol=1e-4), "f32 mismatch vs reference"

    # bf16-MXU path (f32 accumulation) — higher MXU throughput on v6e/v7x.
    out_bf16 = mini_triplet_forward(x, w1, b1, w2, b2, mxu_dtype=jnp.bfloat16)
    out_bf16 = jax.block_until_ready(out_bf16)
    assert out_bf16.shape == x.shape
    assert jnp.allclose(out_bf16, ref, atol=1e-1, rtol=1e-1), "bf16 mismatch vs reference"

    print("KERNEL_OK")
</pallas_src>

<mosaic_0001>
module attributes {stable_mosaic.version = 11 : i64} {
  func.func @_mlp_kernel(%arg0: i32, %arg1: memref<16x128xf32, #tpu.memory_space<vmem>>, %arg2: memref<128x128xf32, #tpu.memory_space<vmem>>, %arg3: memref<1x128xf32, #tpu.memory_space<vmem>>, %arg4: memref<128x128xf32, #tpu.memory_space<vmem>>, %arg5: memref<1x128xf32, #tpu.memory_space<vmem>>, %arg6: memref<16x128xf32, #tpu.memory_space<vmem>>) attributes {dimension_semantics = [#tpu.dimension_semantics<parallel>], iteration_bounds = array<i64: 1>, scalar_prefetch = 0 : i64, scratch_operands = 0 : i64, tpu.core_type = #tpu.core_type<tc>, window_params = [{transform_indices = @transform_0, window_bounds = array<i64: 16, 128>}, {pipeline_mode = #tpu.pipeline_mode<synchronous>, transform_indices = @transform_1, window_bounds = array<i64: 128, 128>}, {pipeline_mode = #tpu.pipeline_mode<synchronous>, transform_indices = @transform_2, window_bounds = array<i64: 1, 128>}, {pipeline_mode = #tpu.pipeline_mode<synchronous>, transform_indices = @transform_3, window_bounds = array<i64: 128, 128>}, {pipeline_mode = #tpu.pipeline_mode<synchronous>, transform_indices = @transform_4, window_bounds = array<i64: 1, 128>}, {transform_indices = @transform_5, window_bounds = array<i64: 16, 128>}]} {
    %c0 = arith.constant 0 : index
    %c0_0 = arith.constant 0 : index
    %0 = vector.load %arg1[%c0, %c0_0] : memref<16x128xf32, #tpu.memory_space<vmem>>, vector<16x128xf32>
    %c0_1 = arith.constant 0 : index
    %c0_2 = arith.constant 0 : index
    %1 = vector.load %arg2[%c0_1, %c0_2] : memref<128x128xf32, #tpu.memory_space<vmem>>, vector<128x128xf32>
    %c0_3 = arith.constant 0 : index
    %c0_4 = arith.constant 0 : index
    %2 = vector.load %arg4[%c0_3, %c0_4] : memref<128x128xf32, #tpu.memory_space<vmem>>, vector<128x128xf32>
    %cst = arith.constant dense<0.000000e+00> : vector<16x128xf32>
    %3 = tpu.matmul %0, %1, %cst {dimension_numbers = #tpu.dot_dimension_numbers<[1], [1], [0], [0], [0, 0, 1, 0], [], []>} : vector<16x128xf32>, vector<128x128xf32>, vector<16x128xf32> -> vector<16x128xf32>
    %c0_5 = arith.constant 0 : index
    %c0_6 = arith.constant 0 : index
    %4 = vector.load %arg3[%c0_5, %c0_6] : memref<1x128xf32, #tpu.memory_space<vmem>>, vector<1x128xf32>
    %5 = vector.broadcast %4 : vector<1x128xf32> to vector<16x128xf32>
    %6 = arith.addf %3, %5 : vector<16x128xf32>
    %cst_7 = arith.constant 0.000000e+00 : f32
    %7 = vector.broadcast %cst_7 : f32 to vector<16x128xf32>
    %8 = arith.maximumf %6, %7 : vector<16x128xf32>
    %cst_8 = arith.constant dense<0.000000e+00> : vector<16x128xf32>
    %9 = tpu.matmul %8, %2, %cst_8 {dimension_numbers = #tpu.dot_dimension_numbers<[1], [1], [0], [0], [0, 0, 1, 0], [], []>} : vector<16x128xf32>, vector<128x128xf32>, vector<16x128xf32> -> vector<16x128xf32>
    %c0_9 = arith.constant 0 : index
    %c0_10 = arith.constant 0 : index
    %10 = vector.load %arg5[%c0_9, %c0_10] : memref<1x128xf32, #tpu.memory_space<vmem>>, vector<1x128xf32>
    %11 = vector.broadcast %10 : vector<1x128xf32> to vector<16x128xf32>
    %12 = arith.addf %9, %11 : vector<16x128xf32>
    %c0_11 = arith.constant 0 : index
    %c0_12 = arith.constant 0 : index
    %13 = vector.load %arg6[%c0_11, %c0_12] : memref<16x128xf32, #tpu.memory_space<vmem>>, vector<16x128xf32>
    tpu.vector_store %arg6[%c0_11, %c0_12], %12 {strides = array<i32>} : memref<16x128xf32, #tpu.memory_space<vmem>>, vector<16x128xf32>,
    return
  }
  func.func @transform_0(%arg0: i32) -> (i32, i32) {
    %c0_i32 = arith.constant 0 : i32
    %c0_i32_0 = arith.constant 0 : i32
    return %arg0, %c0_i32 : i32, i32
  }
  func.func @transform_1(%arg0: i32) -> (i32, i32) {
    %c0_i32 = arith.constant 0 : i32
    %c0_i32_0 = arith.constant 0 : i32
    %c0_i32_1 = arith.constant 0 : i32
    return %c0_i32, %c0_i32_0 : i32, i32
  }
  func.func @transform_2(%arg0: i32) -> (i32, i32) {
    %c0_i32 = arith.constant 0 : i32
    %c0_i32_0 = arith.constant 0 : i32
    %c0_i32_1 = arith.constant 0 : i32
    return %c0_i32, %c0_i32_0 : i32, i32
  }
  func.func @transform_3(%arg0: i32) -> (i32, i32) {
    %c0_i32 = arith.constant 0 : i32
    %c0_i32_0 = arith.constant 0 : i32
    %c0_i32_1 = arith.constant 0 : i32
    return %c0_i32, %c0_i32_0 : i32, i32
  }
  func.func @transform_4(%arg0: i32) -> (i32, i32) {
    %c0_i32 = arith.constant 0 : i32
    %c0_i32_0 = arith.constant 0 : i32
    %c0_i32_1 = arith.constant 0 : i32
    return %c0_i32, %c0_i32_0 : i32, i32
  }
  func.func @transform_5(%arg0: i32) -> (i32, i32) {
    %c0_i32 = arith.constant 0 : i32
    %c0_i32_0 = arith.constant 0 : i32
    return %arg0, %c0_i32 : i32, i32
  }
}

</mosaic_0001>

<bundles_post_ra>
// kernel: tpu_custom_call.1
= control target key start
LH: loop header
LB: loop body
LE: loop exit
PB: predicated region body
PF: predicated region fallthrough
CT: control target
= control target key end

     0   :  { %10 = vsyncpa [#allocation3], 0  ;;  %s663_s0 = inlined_call_operand.hbm [shape: f32[16,128], index: 0, kind: input, shape index: {}]   ;;  %s664_s1 = inlined_call_operand.hbm [shape: f32[128,128], index: 1, kind: input, shape index: {}]   ;;  %s665_s2 = inlined_call_operand.vmem [shape: f32[1,128], index: 2, kind: input, shape index: {}]   ;;  %s666_s3 = inlined_call_operand.hbm [shape: f32[128,128], index: 3, kind: input, shape index: {}]   ;;  %s667_s4 = inlined_call_operand.vmem [shape: f32[1,128], index: 4, kind: input, shape index: {}]   ;;  %s668_s5 = inlined_call_operand.hbm [shape: f32[16,128], index: 5, kind: output, shape index: {}]  }
   0x1   :  { %11 = vsyncpa [#allocation6], 0 }
   0x2   :  { %12 = vsyncpa [#allocation4], 0  ;;  %s554_s18 = smov [#allocation5]   ;;  %s555_s20 = smov [#allocation2]  }
   0x3   :  { %s30_s19 = sshll.u32 %s554_s18, 4  ;;  %s18_s21 = sshll.u32 %s555_s20, 4  ;;  %s31_s19 = int_to_ptr.vmem [resolvable:$true] %s30_s19  ;;  %s590_s21 = int_to_ptr.vmem [resolvable:$true] %s18_s21 }
   0x4   :  { %s460_s24 = scalar_lea.hbm %s664_s1, 2048 }
   0x5   :  { %p461_p0 = scmp.ne.s32.totalorder %s664_s1, %s460_s24  ;;  %p464_p1 = scmp.lt.u32.totalorder %s460_s24, %s664_s1 }
   0x7   :  { %p466_p2 = pnand %p464_p1, %p461_p0 }
   0x9   :  { %469 = shalt.err (!%p466_p2)
}
   0xa   :  { %s470_s29 = scalar_lea.vmem %s31_s19, 2048  ;;  %p475_p4 = scmp.lt.s32.totalorder %s31_s19, %s31_s19 }
   0xb   :  { %p471_p3 = scmp.ne.s32.totalorder %s31_s19, %s470_s29  ;;  %p476_p5 = scmp.lt.s32.totalorder %s470_s29, %s470_s29 }
   0xd   :  { %p477_p6 = por %p476_p5, %p475_p4 }
   0xf   :  { %p478_p7 = pnand %p477_p6, %p471_p3 }
  0x11   :  { %481 = shalt.err (!%p478_p7)
}
  0x12   :  { %s556_s30 = smov 128   ;;  %s557_s6 = smov 8  }
  0x13   :  { %36 = dma.hbm_to_vmem [thread:$0]  %s664_s1, 2048, %s31_s19, [#allocation6], %s556_s30, %s556_s30, %s557_s6  }
  0x14   :  { %s482_s11 = scalar_lea.hbm %s663_s0, 256 }
  0x15   :  { %p483_p8 = scmp.ne.s32.totalorder %s663_s0, %s482_s11  ;;  %p486_p9 = scmp.lt.u32.totalorder %s482_s11, %s663_s0 }
  0x17   :  { %p488_p10 = pnand %p486_p9, %p483_p8 }
  0x19   :  { %491 = shalt.err (!%p488_p10)
}
  0x1a   :  { %s492_s16 = scalar_lea.vmem %s590_s21, 256  ;;  %p497_p12 = scmp.lt.s32.totalorder %s590_s21, %s590_s21 }
  0x1b   :  { %p493_p11 = scmp.ne.s32.totalorder %s590_s21, %s492_s16  ;;  %p498_p13 = scmp.lt.s32.totalorder %s492_s16, %s492_s16 }
  0x1d   :  { %p499_p0 = por %p498_p13, %p497_p12 }
  0x1f   :  { %p500_p1 = pnand %p499_p0, %p493_p11 }
  0x21   :  { %503 = shalt.err (!%p500_p1)
}
  0x22   :  { %24 = dma.hbm_to_vmem [thread:$0]  %s663_s0, 256, %s590_s21, [#allocation3], %s556_s30, %s556_s30, %s557_s6  }
  0x23   :  { %s558_s18 = smov [#allocation7]   ;;  %s504_s23 = scalar_lea.hbm %s666_s3, 2048 }
  0x24   :  { %s44_s19 = sshll.u32 %s558_s18, 4  ;;  %p505_p2 = scmp.ne.s32.totalorder %s666_s3, %s504_s23  ;;  %s45_s19 = int_to_ptr.vmem [resolvable:$true] %s44_s19 }
  0x25   :  { %p508_p3 = scmp.lt.u32.totalorder %s504_s23, %s666_s3 }
  0x27   :  { %p510_p4 = pnand %p508_p3, %p505_p2 }
  0x29   :  { %513 = shalt.err (!%p510_p4)
}
  0x2a   :  { %s514_s28 = scalar_lea.vmem %s45_s19, 2048  ;;  %p519_p6 = scmp.lt.s32.totalorder %s45_s19, %s45_s19 }
  0x2b   :  { %p515_p5 = scmp.ne.s32.totalorder %s45_s19, %s514_s28  ;;  %p520_p7 = scmp.lt.s32.totalorder %s514_s28, %s514_s28 }
  0x2d   :  { %p521_p8 = por %p520_p7, %p519_p6 }
  0x2f   :  { %p522_p9 = pnand %p521_p8, %p515_p5 }
  0x31   :  { %525 = shalt.err (!%p522_p9)
}
  0x32   :  { %50 = dma.hbm_to_vmem [thread:$0]  %s666_s3, 2048, %s45_s19, [#allocation6], %s556_s30, %s556_s30, %s557_s6  }
  0x33   :  { %548 = dma.done.wait [#allocation3], 256  }
  0x34   :  { %549 = vsyncadd [#allocation3], 4294967040 }
  0x35   :  { %550 = dma.done.wait [#allocation6], 4096  }
  0x36   :  { %551 = vsyncadd [#allocation6], 4294963200  ;;  %v64_v0 = vld [vmem:[#allocation5] sm:$0xff]  ;;  %v65_v1 = vld [vmem:[#allocation5 + $0x8] sm:$0xff]  ;;  %s559_s9 = smov [#allocation8]  }
  0x37   :  { %v66_v2 = vld [vmem:[#allocation5 + $0x10] sm:$0xff]  ;;  %v390_v3 = vpack.c.bf16 %v65_v1, %v64_v0  ;;  %v67_v4 = vld [vmem:[#allocation5 + $0x18] sm:$0xff]  ;;  %v68_v6 = vld [vmem:[#allocation5 + $0x20] sm:$0xff]  ;;  %s269_s10 = sshll.u32 %s559_s9, 4  ;;  %s270_s10 = int_to_ptr.vmem [resolvable:$true] %s269_s10 }
  0x38   :  { %v394_v5 = vpack.c.bf16 %v67_v4, %v66_v2  ;;  %v69_v7 = vld [vmem:[#allocation5 + $0x28] sm:$0xff]  ;;  %v62_v8 = vld [vmem:[#allocation2] sm:$0xff]  ;;  %v80_v9 = vld [vmem:[#allocation7] sm:$0xff]  ;;  %p531_p11 = scmp.lt.s32.totalorder %s270_s10, %s270_s10 }
  0x39   :  { %391 = vmatprep.subr.bf16.mxu0 %v390_v3  ;;  %352 = vmatprep.mubr.f32.mxu0 %v62_v8  ;;  %v81_v10 = vld [vmem:[#allocation7 + $0x8] sm:$0xff]  ;;  %v82_v11 = vld [vmem:[#allocation7 + $0x10] sm:$0xff]  ;;  %v83_v13 = vld [vmem:[#allocation7 + $0x18] sm:$0xff]  ;;  %v398_v15 = vpack.c.bf16 %v69_v7, %v68_v6 }
  0x3a   :  { %393 = vmatpush3.bf16.xpose.msra.mxu0 %v390_v3  ;;  %v422_v12 = vpack.c.bf16 %v81_v10, %v80_v9  ;;  %v426_v14 = vpack.c.bf16 %v83_v13, %v82_v11  ;;  %v84_v16 = vld [vmem:[#allocation7 + $0x20] sm:$0xff]  ;;  %v85_v17 = vld [vmem:[#allocation7 + $0x28] sm:$0xff]  ;;  %v70_v18 = vld [vmem:[#allocation5 + $0x30] sm:$0xff] }
  0x3b   :  { %395 = vmatprep.subr.bf16.mxu0 %v394_v5  ;;  %v71_v19 = vld [vmem:[#allocation5 + $0x38] sm:$0xff]  ;;  %v430_v20 = vpack.c.bf16 %v85_v17, %v84_v16  ;;  %v86_v22 = vld [vmem:[#allocation7 + $0x30] sm:$0xff]  ;;  %v72_v24 = vld [vmem:[#allocation5 + $0x40] sm:$0xff] }
  0x3c   :  { %423 = vmatprep.subr.bf16.mxu1 %v422_v12  ;;  %v402_v21 = vpack.c.bf16 %v71_v19, %v70_v18  ;;  %v87_v23 = vld [vmem:[#allocation7 + $0x38] sm:$0xff]  ;;  %v73_v25 = vld [vmem:[#allocation5 + $0x48] sm:$0xff]  ;;  %v88_v28 = vld [vmem:[#allocation7 + $0x40] sm:$0xff] }
  0x3d   :  { %425 = vmatpush3.bf16.xpose.msra.mxu1 %v422_v12  ;;  %v434_v26 = vpack.c.bf16 %v87_v23, %v86_v22  ;;  %v406_v27 = vpack.c.bf16 %v73_v25, %v72_v24  ;;  %v89_v29 = vld [vmem:[#allocation7 + $0x48] sm:$0xff]  ;;  %v74_v30 = vld [vmem:[#allocation5 + $0x50] sm:$0xff]  ;;  %v75_v31 = vld [vmem:[#allocation5 + $0x58] sm:$0xff] }
  0x3e   :  { %427 = vmatprep.subr.bf16.mxu1 %v426_v14  ;;  %v438_v32 = vpack.c.bf16 %v89_v29, %v88_v28  ;;  %v410_v33 = vpack.c.bf16 %v75_v31, %v74_v30  ;;  %v90_v34 = vld [vmem:[#allocation7 + $0x50] sm:$0xff]  ;;  %v91_v35 = vld [vmem:[#allocation7 + $0x58] sm:$0xff]  ;;  %v76_v36 = vld [vmem:[#allocation5 + $0x60] sm:$0xff] }
  0x3f   :  { %v77_v37 = vld [vmem:[#allocation5 + $0x68] sm:$0xff]  ;;  %v442_v38 = vpack.c.bf16 %v91_v35, %v90_v34  ;;  %v92_v40 = vld [vmem:[#allocation7 + $0x60] sm:$0xff]  ;;  %v78_v42 = vld [vmem:[#allocation5 + $0x70] sm:$0xff] }
  0x40   :  { %v414_v39 = vpack.c.bf16 %v77_v37, %v76_v36  ;;  %v93_v41 = vld [vmem:[#allocation7 + $0x68] sm:$0xff]  ;;  %v79_v43 = vld [vmem:[#allocation5 + $0x78] sm:$0xff]  ;;  %v94_v46 = vld [vmem:[#allocation7 + $0x70] sm:$0xff] }
  0x41   :  { %v446_v44 = vpack.c.bf16 %v93_v41, %v92_v40  ;;  %v418_v45 = vpack.c.bf16 %v79_v43, %v78_v42  ;;  %v95_v47 = vld [vmem:[#allocation7 + $0x78] sm:$0xff]  ;;  %v282_v50 = vld [vmem:[%s665_s2] ss:$0 sm:$0xff]  ;;  %s526_s2 = scalar_lea.vmem %s270_s10, 256 }
  0x42   :  { %397 = vmatpush3.bf16.xpose.msra.mxu0 %v394_v5  ;;  %v450_v48 = vpack.c.bf16 %v95_v47, %v94_v46  ;;  %v63_v49 = vld [vmem:[#allocation2 + $0x8] sm:$0xff]  ;;  %v283_v57 = vld [vmem:[%s667_s4] ss:$0 sm:$0xff]  ;;  %p527_p10 = scmp.ne.s32.totalorder %s270_s10, %s526_s2  ;;  %p532_p12 = scmp.lt.s32.totalorder %s526_s2, %s526_s2 }
  0x43   :  { %399 = vmatprep.subr.bf16.mxu0 %v398_v15 }
  0x44   :  { %p533_p13 = por %p532_p12, %p531_p11 }
  0x45   :  { %429 = vmatpush3.bf16.xpose.msra.mxu1 %v426_v14 }
  0x46   :  { %431 = vmatprep.subr.bf16.mxu1 %v430_v20  ;;  %p534_p0 = pnand %p533_p13, %p527_p10 }
  0x4a   :  { %401 = vmatpush3.bf16.xpose.msra.mxu0 %v398_v15 }
  0x4b   :  { %403 = vmatprep.subr.bf16.mxu0 %v402_v21 }
  0x4d   :  { %433 = vmatpush3.bf16.xpose.msra.mxu1 %v430_v20 }
  0x4e   :  { %435 = vmatprep.subr.bf16.mxu1 %v434_v26 }
  0x52   :  { %405 = vmatpush3.bf16.xpose.msra.mxu0 %v402_v21 }
  0x53   :  { %407 = vmatprep.subr.bf16.mxu0 %v406_v27 }
  0x55   :  { %437 = vmatpush3.bf16.xpose.msra.mxu1 %v434_v26 }
  0x56   :  { %439 = vmatprep.subr.bf16.mxu1 %v438_v32 }
  0x5a   :  { %409 = vmatpush3.bf16.xpose.msra.mxu0 %v406_v27 }
  0x5b   :  { %411 = vmatprep.subr.bf16.mxu0 %v410_v33 }
  0x5d   :  { %441 = vmatpush3.bf16.xpose.msra.mxu1 %v438_v32 }
  0x5e   :  { %443 = vmatprep.subr.bf16.mxu1 %v442_v38 }
  0x62   :  { %413 = vmatpush3.bf16.xpose.msra.mxu0 %v410_v33 }
  0x63   :  { %415 = vmatprep.subr.bf16.mxu0 %v414_v39 }
  0x65   :  { %445 = vmatpush3.bf16.xpose.msra.mxu1 %v442_v38 }
  0x66   :  { %447 = vmatprep.subr.bf16.mxu1 %v446_v44 }
  0x6a   :  { %417 = vmatpush3.bf16.xpose.msra.mxu0 %v414_v39 }
  0x6b   :  { %419 = vmatprep.subr.bf16.mxu0 %v418_v45 }
  0x6d   :  { %449 = vmatpush3.bf16.xpose.msra.mxu1 %v446_v44 }
  0x6e   :  { %451 = vmatprep.subr.bf16.mxu1 %v450_v48 }
  0x72   :  { %421 = vmatpush3.bf16.xpose.msra.mxu0 %v418_v45 }
  0x75   :  { %453 = vmatpush3.bf16.xpose.msra.mxu1 %v450_v48 }
  0x79   :  { %353 = vmatmul.mubr.f32.vlgmr.msra.gmra.mrb[0].mxu0 %v63_v49 }
 0x14c   :  { %v354_v51 = vpop.f32.mrb[0].mxu0 }
 0x14d   :  { %v175_v52 = vadd.f32 %v354_v51, %v282_v50  ;;  %v169_v53 = vpop.f32.mrb[1].mxu0 }
 0x14e   :  { %v170_v54 = vadd.f32 %v282_v50, %v169_v53 }
 0x14f   :  { %v179_v56 = vmax.f32 %v175_v52, 0.0 }
 0x150   :  { %v178_v55 = vmax.f32 %v170_v54, 0.0 }
 0x152   :  { %387 = vmatprep.mubr.f32.mxu1 %v178_v55 }
 0x153   :  { %388 = vmatmul.mubr.f32.vlgmr.msra.gmra.mrb[0].mxu1 %v179_v56 }
 0x226   :  { %v389_v58 = vpop.f32.mrb[0].mxu1 }
 0x227   :  { %v259_v59 = vadd.f32 %v389_v58, %v283_v57  ;;  %v253_v60 = vpop.f32.mrb[1].mxu1 }
 0x228   :  { %v254_v61 = vadd.f32 %v283_v57, %v253_v60 }
 0x229   :  { %263 = vst [vmem:[#allocation8 + $0x8] sm:$0xff] %v259_v59 }
 0x22a   :  { %262 = vst [vmem:[#allocation8] sm:$0xff] %v254_v61 }
 0x22b   :  { %537 = shalt.err (!%p534_p0)
}
 0x22c   :  { %s538_s4 = scalar_lea.hbm %s668_s5, 256 }
 0x22d   :  { %p539_p1 = scmp.ne.s32.totalorder %s668_s5, %s538_s4  ;;  %p542_p2 = scmp.lt.u32.totalorder %s538_s4, %s668_s5 }
 0x22f   :  { %p544_p3 = pnand %p542_p2, %p539_p1 }
 0x231   :  { %547 = shalt.err (!%p544_p3)
}
 0x232   :  { %275 = dma.vmem_to_hbm [thread:$0]  %s270_s10, 256, %s668_s5, [#allocation4], %s556_s30, %s556_s30, %s557_s6  }
 0x233   :  { %552 = dma.done.wait [#allocation4], 256  }
 0x234   :  { %553 = vsyncadd [#allocation4], 4294967040 }
 0x235   :  { %279 = vsyncpa [#allocation3], 1 }
 0x236   :  { %280 = vsyncpa [#allocation6], 1 }
 0x237   :  { %281 = vsyncpa [#allocation4], 1 }

</bundles_post_ra>
